<compile_context>
chip_gen: v7x
topology: tpu7x:2x2x1
jax: 0.10.0
libtpu: 0.0.40
codegen_flags: <defaults>
</compile_context>

<pallas_src>
import jax
import jax.numpy as jnp
from jax.experimental import pallas as pl
from jax.experimental.pallas import tpu as pltpu


# ------------------------------ small helpers --------------------------------

def _round_up(x, m):
    return (x + m - 1) // m * m


def _pad_last(a, to):
    pad = to - a.shape[-1]
    if pad <= 0:
        return a
    return jnp.pad(a, [(0, 0)] * (a.ndim - 1) + [(0, pad)])


def _pick_tm(M, cap=2048):
    # Largest row tile <= cap that divides M.  No ">=2 grid steps" constraint:
    # per-step overhead dominates for the small pyramid levels (review #9).
    for cand in (2048, 1024, 512, 256, 128, 64, 32, 16, 8):
        if cand <= cap and cand <= M and M % cand == 0:
            return cand
    return M


def fold_bn(gamma, beta, mean, var, eps=1e-5):
    scale = gamma / jnp.sqrt(var + eps)
    bias = beta - mean * scale
    return scale, bias


# ------------------------- Pallas kernel 1: 1x1 conv -------------------------
# fused: (X @ W_scaled) + bias, ReLU.  W already has the BN scale folded in.

def _mm_bias_relu_kernel(x_ref, w_ref, b_ref, o_ref):
    acc = jnp.dot(x_ref[...], w_ref[...], preferred_element_type=jnp.float32)
    o_ref[...] = jnp.maximum(acc + b_ref[...], 0.0).astype(o_ref.dtype)


def fused_matmul_bias_relu(x2d, w2d, bias2d, out_dtype=jnp.bfloat16):
    """x2d: (M, K) bf16, w2d: (K, Cout) bf16 (Cout % 128 == 0), bias2d: (1, Cout) f32."""
    M, K = x2d.shape
    Cout = w2d.shape[1]
    TM = _pick_tm(M)
    grid = (M // TM,)
    return pl.pallas_call(
        _mm_bias_relu_kernel,
        out_shape=jax.ShapeDtypeStruct((M, Cout), out_dtype),
        grid_spec=pltpu.PrefetchScalarGridSpec(
            num_scalar_prefetch=0,
            grid=grid,
            in_specs=[
                pl.BlockSpec((TM, K), lambda i: (i, 0)),
                pl.BlockSpec((K, Cout), lambda i: (0, 0)),
                pl.BlockSpec((1, Cout), lambda i: (0, 0)),
            ],
            out_specs=pl.BlockSpec((TM, Cout), lambda i: (i, 0)),
        ),
        compiler_params=pltpu.CompilerParams(
            dimension_semantics=("parallel",),
            vmem_limit_bytes=48 * 1024 * 1024),
    )(x2d, w2d, bias2d)


# --------------- Pallas kernel 2: fused 3x3 conv + BN + ReLU + last 1x1 -------
# The padded concat feature map is flattened per image to (N, (Hp+3)*WP, 384)
# with WP = round_up(W+2, 16).  A row tile r covers output rows
# q in [r*TQ, (r+1)*TQ) with TQ = TR*WP; the input window it needs is the
# contiguous row range [r*TQ, r*TQ + TQ + 2*WP + 2), which is fetched into a
# double-buffered VMEM scratch via manual DMA (the halo cannot be expressed
# with Blocked index maps).  Tap (dh, dw) is the window rows
# [dh*WP + dw, dh*WP + dw + TQ): the dh offsets are 16-aligned, the dw shift
# is shared across the three dh taps (one shifted window load per dw).
# The last 1x1 conv (256 feature + contour channels) is applied in-kernel so
# the 256-channel intermediate never touches HBM.

def make_conv3x3_last_kernel(WP, TQ, WIN):
    L = TQ + 2 * WP  # shifted-window length

    def kernel(x_hbm, ctr_ref, w9_ref, wlx_ref, wlc_ref, bc_ref, bl_ref,
               o_ref, win, sem):
        n = pl.program_id(0)
        r = pl.program_id(1)
        nr = pl.num_programs(1)
        slot = r % 2

        def dma(row_tile, s):
            return pltpu.make_async_copy(
                x_hbm.at[n, pl.ds(row_tile * TQ, WIN), :],
                win.at[s],
                sem.at[s])

        # prime the pipeline at the first row tile of every image
        @pl.when(r == 0)
        def _():
            dma(0, 0).start()

        dma(r, slot).wait()

        # prefetch the next row tile of the same image
        @pl.when(r + 1 < nr)
        def _():
            dma(r + 1, 1 - slot).start()

        # 9-tap conv accumulated in a local value (no VMEM acc round trips)
        acc = None
        for dw in range(3):
            zdw = win[slot, pl.ds(dw, L), :]            # (L, 384) bf16
            for dh in range(3):
                z = zdw[dh * WP:dh * WP + TQ, :]        # 16-aligned value slice
                t = jnp.dot(z, w9_ref[3 * dh + dw],
                            preferred_element_type=jnp.float32)
                acc = t if acc is None else acc + t

        xconv = jnp.maximum(acc + bc_ref[...], 0.0)      # (TQ, 256) f32
        # TODO(synk): nn.Dropout(0.5) is identity under eval/inference semantics.
        out = jnp.dot(xconv.astype(jnp.bfloat16), wlx_ref[...],
                      preferred_element_type=jnp.float32)          # (TQ, out_dim)
        out = out + jnp.dot(ctr_ref[0], wlc_ref[...],
                            preferred_element_type=jnp.float32)    # contour term
        o_ref[0] = jnp.maximum(out + bl_ref[...], 0.0).astype(o_ref.dtype)

    return kernel


def conv3x3_last_fused(x_slab, ctr_flat, w9, wlx, wlc, bconv, blast,
                       N, Hp, WP, TR, out_dim):
    """x_slab: (N, (Hp+3)*WP, 384) bf16 in HBM; returns (N, Hp*WP, out_dim) f32."""
    R = Hp // TR
    TQ = TR * WP
    WIN = TQ + 2 * WP + 16            # halo + a little slack, multiple of 16
    C = x_slab.shape[-1]
    Cc = ctr_flat.shape[-1]

    kern = make_conv3x3_last_kernel(WP, TQ, WIN)
    return pl.pallas_call(
        kern,
        out_shape=jax.ShapeDtypeStruct((N, Hp * WP, out_dim), jnp.float32),
        grid_spec=pltpu.PrefetchScalarGridSpec(
            num_scalar_prefetch=0,
            grid=(N, R),
            in_specs=[
                pl.BlockSpec(memory_space=pl.ANY),                       # x_slab (HBM)
                pl.BlockSpec((1, TQ, Cc), lambda n, r: (n, r, 0)),       # contour
                pl.BlockSpec(w9.shape, lambda n, r: (0, 0, 0)),          # conv weights
                pl.BlockSpec(wlx.shape, lambda n, r: (0, 0)),            # last-conv W (feat)
                pl.BlockSpec(wlc.shape, lambda n, r: (0, 0)),            # last-conv W (contour)
                pl.BlockSpec(bconv.shape, lambda n, r: (0, 0)),          # conv bias
                pl.BlockSpec(blast.shape, lambda n, r: (0, 0)),          # last bias
            ],
            out_specs=pl.BlockSpec((1, TQ, out_dim), lambda n, r: (n, r, 0)),
            scratch_shapes=[
                pltpu.VMEM((2, WIN, C), jnp.bfloat16),   # double-buffered window
                pltpu.SemaphoreType.DMA((2,)),
            ],
        ),
        compiler_params=pltpu.CompilerParams(
            dimension_semantics=("parallel", "arbitrary"),
            vmem_limit_bytes=48 * 1024 * 1024),
    )(x_slab, ctr_flat, w9, wlx, wlc, bconv, blast)


# ------------------------------ JAX glue --------------------------------------

def _interp_matrix(out_size, in_size):
    """Exact F.interpolate(mode='bilinear', align_corners=True) 1-D weights."""
    if in_size == 1:
        return jnp.ones((out_size, 1), jnp.float32)
    if out_size == 1:
        m = jnp.zeros((1, in_size), jnp.float32)
        return m.at[0, 0].set(1.0)
    coords = jnp.arange(out_size, dtype=jnp.float32) * (
        (in_size - 1) / (out_size - 1))
    lo = jnp.clip(jnp.floor(coords).astype(jnp.int32), 0, in_size - 2)
    frac = coords - lo.astype(jnp.float32)
    rows = jnp.arange(out_size)
    m = jnp.zeros((out_size, in_size), jnp.float32)
    m = m.at[rows, lo].add(1.0 - frac)
    m = m.at[rows, lo + 1].add(frac)
    return m


def bilinear_resize_ac(x_nhwc, Hout, Wout):
    N, H, W, C = x_nhwc.shape
    Mh = _interp_matrix(Hout, H)
    Mw = _interp_matrix(Wout, W)
    y = jnp.einsum('ph,nhwc->npwc', Mh, x_nhwc)
    y = jnp.einsum('qw,npwc->npqc', Mw, y)
    return y


# --------------------------- parameter creation ------------------------------

def _conv_w(key, cout, cin, kh, kw):
    fan_in = cin * kh * kw
    return jax.random.normal(key, (cout, cin, kh, kw), jnp.float32) / jnp.sqrt(
        float(fan_in))


def _bn_p(key, c):
    k1, k2, k3, k4 = jax.random.split(key, 4)
    gamma = 1.0 + 0.1 * jax.random.normal(k1, (c,), jnp.float32)
    beta = 0.1 * jax.random.normal(k2, (c,), jnp.float32)
    mean = 0.05 * jax.random.normal(k3, (c,), jnp.float32)
    var = 1.0 + 0.1 * jnp.abs(jax.random.normal(k4, (c,), jnp.float32))
    return (gamma, beta, mean, var)


def init_params(key, out_dim):
    ks = jax.random.split(key, 10)
    return {
        'bran1': {'w': _conv_w(ks[0], 96, 64, 1, 1), 'bn': _bn_p(ks[1], 96)},
        'bran2': {'w': _conv_w(ks[2], 96, 128, 1, 1), 'bn': _bn_p(ks[3], 96)},
        'bran3': {'w': _conv_w(ks[4], 96, 256, 1, 1), 'bn': _bn_p(ks[5], 96)},
        'conv': {'w': _conv_w(ks[6], 256, 288, 3, 3), 'bn': _bn_p(ks[7], 256)},
        'last': {'w': _conv_w(ks[8], out_dim, 258, 1, 1),
                 'bn': _bn_p(ks[9], out_dim)},
    }


# ------------------------------ forward pass ---------------------------------

def feature_pyramid_decoder(params, x1_3, x1_2, x1_1, contour):
    """Inputs in NCHW (PyTorch convention); output in NCHW."""
    nhwc = lambda t: jnp.transpose(t, (0, 2, 3, 1))
    x3in, x2in, x1in = nhwc(x1_3), nhwc(x1_2), nhwc(x1_1)
    ctr = nhwc(contour).astype(jnp.float32)                  # (N, H, W, 2)

    nb = params['bran1']['w'].shape[0]          # 96 branch channels
    CB = _round_up(nb, 128)                     # lane-dense branch width (128)

    def branch(x, p):  # CustomBlock: 1x1 conv (no bias) + BN + ReLU (BN folded)
        N, H, W, Cin = x.shape
        scale, bias = fold_bn(*p['bn'])
        w = jnp.transpose(p['w'][:, :, 0, 0], (1, 0)) * scale[None, :]   # (Cin, nb)
        wpad = _pad_last(w, CB).astype(jnp.bfloat16)
        bpad = _pad_last(bias.reshape(1, -1), CB).astype(jnp.float32)
        y = fused_matmul_bias_relu(
            x.reshape(N * H * W, Cin).astype(jnp.bfloat16), wpad, bpad)
        return y.reshape(N, H, W, CB)

    # TODO(synk): the three branch calls could be merged into one pallas_call
    # (scalar-prefetched offsets) to amortize launch/pipeline warm-up cost.
    x3 = branch(x3in, params['bran3'])
    x2 = branch(x2in, params['bran2'])
    x1 = branch(x1in, params['bran1'])

    N, H, W, _ = x1.shape
    x3u = bilinear_resize_ac(x3, H, W).astype(jnp.bfloat16)
    x2u = bilinear_resize_ac(x2, H, W).astype(jnp.bfloat16)

    # geometry for the fused 3x3 + last-1x1 kernel
    WP = _round_up(W + 2, 16)                      # padded row width (aligned)
    TR = max(1, min(2048 // WP, (H + 1) // 2))     # image rows per tile
    Hp = _round_up(H, TR)

    # cat((x3, x2, x1), channels) -> 3*128 channels, pads carry zeros;
    # spatial zero-pad (top 1, bottom Hp-H+2, left 1, right WP-W-1), flatten.
    xcat = jnp.concatenate([x3u, x2u, x1], axis=-1)                  # (N,H,W,384)
    xp = jnp.pad(xcat, ((0, 0), (1, Hp - H + 2), (1, WP - W - 1), (0, 0)))
    x_slab = xp.reshape(N, (Hp + 3) * WP, 3 * CB)

    # contour: pad 2 -> 8 channels, pad spatially to (Hp, WP), flatten
    Cc = 8
    ctrp = jnp.pad(ctr, ((0, 0), (0, Hp - H), (0, WP - W), (0, Cc - ctr.shape[-1])))
    ctr_flat = ctrp.reshape(N, Hp * WP, Cc).astype(jnp.bfloat16)

    # 3x3 conv weights (256, 288, 3, 3): fold BN scale, scatter 3x96 real
    # input channels into the 3x128 padded layout, reshape to (9, 384, 256).
    scale_c, bias_c = fold_bn(*params['conv']['bn'])
    w_k = jnp.transpose(params['conv']['w'], (2, 3, 1, 0)) * scale_c  # (3,3,288,256)
    Cmid = w_k.shape[-1]                                              # 256
    w384 = jnp.zeros((3, 3, 3 * CB, Cmid), jnp.float32)
    w384 = w384.at[:, :, 0:nb].set(w_k[:, :, 0:nb])
    w384 = w384.at[:, :, CB:CB + nb].set(w_k[:, :, nb:2 * nb])
    w384 = w384.at[:, :, 2 * CB:2 * CB + nb].set(w_k[:, :, 2 * nb:3 * nb])
    w9 = w384.reshape(9, 3 * CB, Cmid).astype(jnp.bfloat16)
    bconv = bias_c.reshape(1, Cmid).astype(jnp.float32)

    # last 1x1 conv over cat((conv_out 256, contour 2)), BN folded
    out_dim = params['last']['w'].shape[0]
    scale_l, bias_l = fold_bn(*params['last']['bn'])
    wl = (params['last']['w'][:, :, 0, 0] * scale_l[:, None]).T       # (258, out_dim)
    wlx = wl[:Cmid].astype(jnp.bfloat16)                              # (256, out_dim)
    wlc = jnp.zeros((Cc, out_dim), jnp.float32).at[:2].set(wl[Cmid:Cmid + 2])
    wlc = wlc.astype(jnp.bfloat16)                                    # (8,   out_dim)
    blast = bias_l.reshape(1, -1).astype(jnp.float32)                 # (1,   out_dim)

    out_flat = conv3x3_last_fused(x_slab, ctr_flat, w9, wlx, wlc, bconv, blast,
                                  N, Hp, WP, TR, out_dim)
    out = out_flat.reshape(N, Hp, WP, out_dim)[:, :H, :W, :]
    return jnp.transpose(out, (0, 3, 1, 2))                           # NCHW


# --------------------------------- main ---------------------------------------

if __name__ == "__main__":
    key = jax.random.PRNGKey(0)
    k1, k2, k3, k4 = jax.random.split(key, 4)

    N, out_dim = 2, 8
    H1, W1 = 16, 16
    x1_1 = jax.random.normal(k1, (N, 64, H1, W1), jnp.float32)             # largest
    x1_2 = jax.random.normal(k2, (N, 128, H1 // 2, W1 // 2), jnp.float32)
    x1_3 = jax.random.normal(k3, (N, 256, H1 // 4, W1 // 4), jnp.float32)  # smallest
    contour = jax.random.normal(k4, (N, 2, H1, W1), jnp.float32)

    params = init_params(jax.random.PRNGKey(123), out_dim)

    out = feature_pyramid_decoder(params, x1_3, x1_2, x1_1, contour)
    out = jax.block_until_ready(out)
    assert out.shape == (N, out_dim, H1, W1), out.shape
    assert bool(jnp.all(jnp.isfinite(out)))
    print("KERNEL_OK")
</pallas_src>

<mosaic_0001>
module attributes {stable_mosaic.version = 11 : i64} {
  func.func @_mm_bias_relu_kernel(%arg0: i32, %arg1: memref<32x256xbf16, #tpu.memory_space<vmem>>, %arg2: memref<256x128xbf16, #tpu.memory_space<vmem>>, %arg3: memref<1x128xf32, #tpu.memory_space<vmem>>, %arg4: memref<32x128xbf16, #tpu.memory_space<vmem>>) attributes {dimension_semantics = [#tpu.dimension_semantics<parallel>], iteration_bounds = array<i64: 1>, scalar_prefetch = 0 : i64, scratch_operands = 0 : i64, tpu.core_type = #tpu.core_type<tc>, window_params = [{transform_indices = @transform_0, window_bounds = array<i64: 32, 256>}, {pipeline_mode = #tpu.pipeline_mode<synchronous>, transform_indices = @transform_1, window_bounds = array<i64: 256, 128>}, {pipeline_mode = #tpu.pipeline_mode<synchronous>, transform_indices = @transform_2, window_bounds = array<i64: 1, 128>}, {transform_indices = @transform_3, window_bounds = array<i64: 32, 128>}]} {
    %c0 = arith.constant 0 : index
    %c0_0 = arith.constant 0 : index
    %0 = vector.load %arg1[%c0, %c0_0] : memref<32x256xbf16, #tpu.memory_space<vmem>>, vector<32x256xbf16>
    %c0_1 = arith.constant 0 : index
    %c0_2 = arith.constant 0 : index
    %1 = vector.load %arg2[%c0_1, %c0_2] : memref<256x128xbf16, #tpu.memory_space<vmem>>, vector<256x128xbf16>
    %cst = arith.constant dense<0.000000e+00> : vector<32x128xf32>
    %2 = tpu.matmul %0, %1, %cst {dimension_numbers = #tpu.dot_dimension_numbers<[1], [0], [0], [1], [0, 0, 1, 1], [], []>} : vector<32x256xbf16>, vector<256x128xbf16>, vector<32x128xf32> -> vector<32x128xf32>
    %c0_3 = arith.constant 0 : index
    %c0_4 = arith.constant 0 : index
    %3 = vector.load %arg3[%c0_3, %c0_4] : memref<1x128xf32, #tpu.memory_space<vmem>>, vector<1x128xf32>
    %4 = vector.broadcast %3 : vector<1x128xf32> to vector<32x128xf32>
    %5 = arith.addf %2, %4 : vector<32x128xf32>
    %cst_5 = arith.constant 0.000000e+00 : f32
    %6 = vector.broadcast %cst_5 : f32 to vector<32x128xf32>
    %7 = arith.maximumf %5, %6 : vector<32x128xf32>
    %8 = arith.truncf %7 : vector<32x128xf32> to vector<32x128xbf16>
    %c0_6 = arith.constant 0 : index
    %c0_7 = arith.constant 0 : index
    %9 = vector.load %arg4[%c0_6, %c0_7] : memref<32x128xbf16, #tpu.memory_space<vmem>>, vector<32x128xbf16>
    tpu.vector_store %arg4[%c0_6, %c0_7], %8 {strides = array<i32>} : memref<32x128xbf16, #tpu.memory_space<vmem>>, vector<32x128xbf16>,
    return
  }
  func.func @transform_0(%arg0: i32) -> (i32, i32) {
    %c0_i32 = arith.constant 0 : i32
    %c0_i32_0 = arith.constant 0 : i32
    return %arg0, %c0_i32 : i32, i32
  }
  func.func @transform_1(%arg0: i32) -> (i32, i32) {
    %c0_i32 = arith.constant 0 : i32
    %c0_i32_0 = arith.constant 0 : i32
    %c0_i32_1 = arith.constant 0 : i32
    return %c0_i32, %c0_i32_0 : i32, i32
  }
  func.func @transform_2(%arg0: i32) -> (i32, i32) {
    %c0_i32 = arith.constant 0 : i32
    %c0_i32_0 = arith.constant 0 : i32
    %c0_i32_1 = arith.constant 0 : i32
    return %c0_i32, %c0_i32_0 : i32, i32
  }
  func.func @transform_3(%arg0: i32) -> (i32, i32) {
    %c0_i32 = arith.constant 0 : i32
    %c0_i32_0 = arith.constant 0 : i32
    return %arg0, %c0_i32 : i32, i32
  }
}

</mosaic_0001>

<bundles_post_ra>
// kernel: tpu_custom_call.1
= control target key start
LH: loop header
LB: loop body
LE: loop exit
PB: predicated region body
PF: predicated region fallthrough
CT: control target
= control target key end

     0   :  { %8 = vsyncpa [#allocation3], 0  ;;  %s551_s0 = inlined_call_operand.hbm [shape: bf16[32,256], index: 0, kind: input, shape index: {}]   ;;  %s552_s1 = inlined_call_operand.hbm [shape: bf16[256,128], index: 1, kind: input, shape index: {}]   ;;  %s553_s2 = inlined_call_operand.vmem [shape: f32[1,128], index: 2, kind: input, shape index: {}]   ;;  %s554_s3 = inlined_call_operand.hbm [shape: bf16[32,128], index: 3, kind: output, shape index: {}]  }
   0x1   :  { %9 = vsyncpa [#allocation6], 0 }
   0x2   :  { %10 = vsyncpa [#allocation4], 0  ;;  %s479_s12 = smov [#allocation2]   ;;  %s407_s16 = scalar_lea.hbm %s551_s0, 512 }
   0x3   :  { %s16_s13 = sshll.u32 %s479_s12, 4  ;;  %p408_p0 = scmp.ne.s32.totalorder %s551_s0, %s407_s16  ;;  %s17_s13 = int_to_ptr.vmem [resolvable:$true] %s16_s13 }
   0x4   :  { %p411_p1 = scmp.lt.u32.totalorder %s407_s16, %s551_s0 }
   0x6   :  { %p413_p2 = pnand %p411_p1, %p408_p0 }
   0x8   :  { %416 = shalt.err (!%p413_p2)
}
   0x9   :  { %s417_s21 = scalar_lea.vmem %s17_s13, 512  ;;  %p422_p4 = scmp.lt.s32.totalorder %s17_s13, %s17_s13 }
   0xa   :  { %p418_p3 = scmp.ne.s32.totalorder %s17_s13, %s417_s21  ;;  %p423_p5 = scmp.lt.s32.totalorder %s417_s21, %s417_s21 }
   0xc   :  { %p424_p6 = por %p423_p5, %p422_p4 }
   0xe   :  { %p425_p7 = pnand %p424_p6, %p418_p3 }
  0x10   :  { %428 = shalt.err (!%p425_p7)
}
  0x11   :  { %s480_s22 = smov 128   ;;  %s481_s23 = smov 8  }
  0x12   :  { %22 = dma.hbm_to_vmem [thread:$0]  %s551_s0, 512, %s17_s13, [#allocation3], %s480_s22, %s480_s22, %s481_s23  }
  0x13   :  { %s482_s26 = smov [#allocation5]   ;;  %s429_s30 = scalar_lea.hbm %s552_s1, 2048 }
  0x14   :  { %s28_s27 = sshll.u32 %s482_s26, 4  ;;  %p430_p8 = scmp.ne.s32.totalorder %s552_s1, %s429_s30  ;;  %s29_s27 = int_to_ptr.vmem [resolvable:$true] %s28_s27 }
  0x15   :  { %p433_p9 = scmp.lt.u32.totalorder %s429_s30, %s552_s1 }
  0x17   :  { %p435_p10 = pnand %p433_p9, %p430_p8 }
  0x19   :  { %438 = shalt.err (!%p435_p10)
}
  0x1a   :  { %s439_s8 = scalar_lea.vmem %s29_s27, 2048  ;;  %p444_p12 = scmp.lt.s32.totalorder %s29_s27, %s29_s27 }
  0x1b   :  { %p440_p11 = scmp.ne.s32.totalorder %s29_s27, %s439_s8  ;;  %p445_p13 = scmp.lt.s32.totalorder %s439_s8, %s439_s8 }
  0x1d   :  { %p446_p0 = por %p445_p13, %p444_p12 }
  0x1f   :  { %p447_p1 = pnand %p446_p0, %p440_p11 }
  0x21   :  { %450 = shalt.err (!%p447_p1)
}
  0x22   :  { %s483_s0 = smov 64   ;;  %s484_s9 = smov 4  }
  0x23   :  { %34 = dma.hbm_to_vmem [thread:$0]  %s552_s1, 2048, %s29_s27, [#allocation6], %s483_s0, %s483_s0, %s484_s9  }
  0x24   :  { %473 = dma.done.wait [#allocation3], 512  }
  0x25   :  { %474 = vsyncadd [#allocation3], 4294966784 }
  0x26   :  { %475 = dma.done.wait [#allocation6], 2048  }
  0x27   :  { %476 = vsyncadd [#allocation6], 4294965248  ;;  %v385_v0 = vld [vmem:[#allocation5 + $0x40] sm:$0xff]   ;;  %v387_v2 = vld [vmem:[#allocation5 + $0x48] sm:$0xff]   ;;  %s485_s13 = smov [#allocation7]  }
  0x28   :  { %v386_v1 = vld [vmem:[#allocation5] sm:$0xff]   ;;  %334 = vmatprep.subr.bf16.mxu0 %v385_v0  ;;  %362 = vmatprep.subr.bf16.mxu1 %v385_v0  ;;  %v388_v3 = vld [vmem:[#allocation5 + $0x8] sm:$0xff]   ;;  %v389_v4 = vld [vmem:[#allocation5 + $0x50] sm:$0xff]   ;;  %s281_s14 = sshll.u32 %s485_s13, 4  ;;  %s282_s14 = int_to_ptr.vmem [resolvable:$true] %s281_s14 }
  0x29   :  { %335 = vmatpush3.bf16.msra.mxu0 %v386_v1  ;;  %370 = vmatpush3.bf16.msra.mxu1 %v386_v1  ;;  %v390_v5 = vld [vmem:[#allocation5 + $0x10] sm:$0xff]   ;;  %v391_v6 = vld [vmem:[#allocation5 + $0x58] sm:$0xff]   ;;  %v393_v8 = vld [vmem:[#allocation5 + $0x60] sm:$0xff]   ;;  %p456_p3 = scmp.lt.s32.totalorder %s282_s14, %s282_s14 }
  0x2a   :  { %336 = vmatprep.subr.bf16.mxu0 %v387_v2  ;;  %363 = vmatprep.subr.bf16.mxu1 %v387_v2  ;;  %v392_v7 = vld [vmem:[#allocation5 + $0x18] sm:$0xff]   ;;  %v394_v9 = vld [vmem:[#allocation5 + $0x20] sm:$0xff]   ;;  %v395_v10 = vld [vmem:[#allocation5 + $0x68] sm:$0xff]  }
  0x2b   :  { %v403_v11 = vld [vmem:[#allocation2 + $0x4] ss:$8 sps:$4 sm:$0xff]   ;;  %v406_v12 = vld [vmem:[#allocation2 + $0x14] ss:$8 sps:$4 sm:$0xff]   ;;  %v401_v18 = vld [vmem:[#allocation2] ss:$8 sps:$4 sm:$0xff]  }
  0x2c   :  { %v396_v13 = vld [vmem:[#allocation5 + $0x28] sm:$0xff]   ;;  %v397_v14 = vld [vmem:[#allocation5 + $0x70] sm:$0xff]   ;;  %235 = vmatprep.mubr.bf16.mxu0 %v403_v11  ;;  %243 = vmatprep.mubr.bf16.mxu1 %v406_v12  ;;  %v399_v16 = vld [vmem:[#allocation5 + $0x78] sm:$0xff]  }
  0x2d   :  { %337 = vmatpush3.bf16.msra.mxu0 %v388_v3  ;;  %371 = vmatpush3.bf16.msra.mxu1 %v388_v3  ;;  %v398_v15 = vld [vmem:[#allocation5 + $0x30] sm:$0xff]   ;;  %v400_v17 = vld [vmem:[#allocation5 + $0x38] sm:$0xff]   ;;  %v294_v22 = vld [vmem:[%s553_s2] ss:$0 sm:$0xff]  ;;  %s451_s2 = scalar_lea.vmem %s282_s14, 256 }
  0x2e   :  { %338 = vmatprep.subr.bf16.mxu0 %v389_v4  ;;  %364 = vmatprep.subr.bf16.mxu1 %v389_v4  ;;  %v404_v19 = vld [vmem:[#allocation2 + $0x10] ss:$8 sps:$4 sm:$0xff]   ;;  %p452_p2 = scmp.ne.s32.totalorder %s282_s14, %s451_s2  ;;  %p457_p4 = scmp.lt.s32.totalorder %s451_s2, %s451_s2 }
  0x30   :  { %p458_p5 = por %p457_p4, %p456_p3 }
  0x31   :  { %339 = vmatpush3.bf16.msra.mxu0 %v390_v5  ;;  %372 = vmatpush3.bf16.msra.mxu1 %v390_v5 }
  0x32   :  { %340 = vmatprep.subr.bf16.mxu0 %v391_v6  ;;  %365 = vmatprep.subr.bf16.mxu1 %v391_v6  ;;  %p459_p6 = pnand %p458_p5, %p452_p2 }
  0x35   :  { %341 = vmatpush3.bf16.msra.mxu0 %v392_v7  ;;  %373 = vmatpush3.bf16.msra.mxu1 %v392_v7 }
  0x36   :  { %342 = vmatprep.subr.bf16.mxu0 %v393_v8  ;;  %366 = vmatprep.subr.bf16.mxu1 %v393_v8 }
  0x39   :  { %343 = vmatpush3.bf16.msra.mxu0 %v394_v9  ;;  %374 = vmatpush3.bf16.msra.mxu1 %v394_v9 }
  0x3a   :  { %344 = vmatprep.subr.bf16.mxu0 %v395_v10  ;;  %367 = vmatprep.subr.bf16.mxu1 %v395_v10 }
  0x3d   :  { %345 = vmatpush3.bf16.msra.mxu0 %v396_v13  ;;  %375 = vmatpush3.bf16.msra.mxu1 %v396_v13 }
  0x3e   :  { %346 = vmatprep.subr.bf16.mxu0 %v397_v14  ;;  %368 = vmatprep.subr.bf16.mxu1 %v397_v14 }
  0x41   :  { %347 = vmatpush3.bf16.msra.mxu0 %v398_v15  ;;  %376 = vmatpush3.bf16.msra.mxu1 %v398_v15 }
  0x42   :  { %348 = vmatprep.subr.bf16.mxu0 %v399_v16  ;;  %369 = vmatprep.subr.bf16.mxu1 %v399_v16 }
  0x45   :  { %349 = vmatpush3.bf16.msra.mxu0 %v400_v17  ;;  %377 = vmatpush3.bf16.msra.mxu1 %v400_v17 }
  0x48   :  { %236 = vmatmul.mubr.bf16.vlgmr.msra.gmra.mrb[0].mxu0 %v401_v18  ;;  %244 = vmatmul.mubr.bf16.vlgmr.msra.gmra.mrb[0].mxu1 %v404_v19 }
 0x11b   :  { %v350_v20 = vpop.f32.mrb[0].mxu0  ;;  %v356_v21 = vpop.f32.mrb[0].mxu1 }
 0x11c   :  { %v351_v23 = vpop.f32.mrb[1].mxu0  ;;  %v357_v24 = vpop.f32.mrb[1].mxu1 }
 0x11d   :  { %v352_v25 = vadd.f32 %v351_v23, %v350_v20  ;;  %v358_v26 = vadd.f32 %v357_v24, %v356_v21  ;;  %v353_v27 = vpop.f32.mrb[2].mxu0  ;;  %v359_v28 = vpop.f32.mrb[2].mxu1 }
 0x11e   :  { %v354_v29 = vpop.f32.mrb[3].mxu0  ;;  %v360_v30 = vpop.f32.mrb[3].mxu1 }
 0x11f   :  { %v238_v31 = vadd.f32 %v352_v25, %v294_v22  ;;  %v246_v32 = vadd.f32 %v358_v26, %v294_v22  ;;  %v355_v33 = vadd.f32 %v354_v29, %v353_v27  ;;  %v361_v34 = vadd.f32 %v360_v30, %v359_v28 }
 0x121   :  { %v241_v35 = vadd.f32 %v355_v33, %v294_v22  ;;  %v249_v36 = vadd.f32 %v361_v34, %v294_v22  ;;  %v252_v37 = vmax.f32 %v238_v31, 0.0  ;;  %v254_v38 = vmax.f32 %v246_v32, 0.0 }
 0x123   :  { %v253_v39 = vmax.f32 %v241_v35, 0.0  ;;  %v255_v40 = vmax.f32 %v249_v36, 0.0 }
 0x125   :  { %v326_v41 = vpack.c.bf16 %v253_v39, %v252_v37  ;;  %v331_v42 = vpack.c.bf16 %v255_v40, %v254_v38 }
 0x127   :  { %327 = vst [vmem:[#allocation7] sm:$0xff] %v326_v41   ;;  %333 = vst [vmem:[#allocation7 + $0x8] sm:$0xff] %v331_v42  }
 0x128   :  { %462 = shalt.err (!%p459_p6)
}
 0x129   :  { %s463_s17 = scalar_lea.hbm %s554_s3, 256 }
 0x12a   :  { %p464_p7 = scmp.ne.s32.totalorder %s554_s3, %s463_s17  ;;  %p467_p8 = scmp.lt.u32.totalorder %s463_s17, %s554_s3 }
 0x12c   :  { %p469_p9 = pnand %p467_p8, %p464_p7 }
 0x12e   :  { %472 = shalt.err (!%p469_p9)
}
 0x12f   :  { %287 = dma.vmem_to_hbm [thread:$0]  %s282_s14, 256, %s554_s3, [#allocation4], %s483_s0, %s483_s0, %s484_s9  }
 0x130   :  { %477 = dma.done.wait [#allocation4], 256  }
 0x131   :  { %478 = vsyncadd [#allocation4], 4294967040 }
 0x132   :  { %291 = vsyncpa [#allocation3], 1 }
 0x133   :  { %292 = vsyncpa [#allocation6], 1 }
 0x134   :  { %293 = vsyncpa [#allocation4], 1 }

</bundles_post_ra>
